<compile_context>
chip_gen: v5e
topology: v5e:2x2
jax: 0.10.0
libtpu: 0.0.40
codegen_flags: <defaults>
</compile_context>

<pallas_src>
import math
import functools

import jax
import jax.numpy as jnp
from jax import lax
from jax.experimental import pallas as pl
from jax.experimental.pallas import tpu as pltpu

JOINT_DIM = 512  # hardcoded in the PyTorch module


def _layernorm(x, gamma, beta, eps):
    # PyTorch LayerNorm: biased variance over the last dim, fp32 math.
    mu = jnp.mean(x, axis=-1, keepdims=True)
    var = jnp.mean(jnp.square(x - mu), axis=-1, keepdims=True)
    return (x - mu) * lax.rsqrt(var + eps) * gamma + beta


def _gelu(x):
    # exact (erf) gelu, as used by BERT-style heads
    return 0.5 * x * (1.0 + lax.erf(x * (1.0 / math.sqrt(2.0))))


def _pick_tile(dim, tile_default):
    # tile_default is a multiple of the layout granule (128 >> 16). For small
    # problems use the full dim: a block equal to the full array dim is always
    # a legal block shape, and avoids any padding copy in HBM.
    return tile_default if dim >= tile_default else dim


# ----------------------------------------------------------------------------
# Kernel 1: project a voken tile into the joint space and layer-norm it.
#   y_tile = LayerNorm(voken_tile @ W2)    -> [tv1, J], stored in mxu dtype
# Tiled over the voken vocabulary; grid axis is parallel.
# ----------------------------------------------------------------------------
def voken_proj_kernel(voken_ref, w2_ref, gy_ref, by_ref, y_ref, *, eps):
    y = jnp.dot(voken_ref[...], w2_ref[...], preferred_element_type=jnp.float32)
    y = _layernorm(y, gy_ref[...], by_ref[...], eps)
    y_ref[...] = y.astype(y_ref.dtype)


# ----------------------------------------------------------------------------
# Kernel 2: 2-D grid (token tiles i, voken tiles j).
#   when j == 0: x = LayerNorm(gelu(bert_tile @ W1 + b1)) -> VMEM scratch [tm, J]
#   every step:  score_tile = (x @ y_tile^T) * (1/sqrt(J))
# dot_general with (1, 1) contraction: MXU consumes y in stored layout, no
# per-step XLU transpose.  The scale is applied to the fp32 accumulator.
# ----------------------------------------------------------------------------
def score_kernel(bert_ref, w1_ref, b1_ref, gx_ref, bx_ref, y_ref,
                 score_ref, x_scratch, *, eps, scale):
    @pl.when(pl.program_id(1) == 0)
    def _():
        x = jnp.dot(bert_ref[...], w1_ref[...], preferred_element_type=jnp.float32)
        x = _gelu(x + b1_ref[...])
        x = _layernorm(x, gx_ref[...], bx_ref[...], eps)
        x_scratch[...] = x.astype(x_scratch.dtype)

    s = lax.dot_general(x_scratch[...], y_ref[...],
                        dimension_numbers=(((1,), (1,)), ((), ())),
                        preferred_element_type=jnp.float32)
    score_ref[...] = (s * scale).astype(score_ref.dtype)


def contrastive_head(bert_output, voken_feats, params, *, eps=1e-12,
                     tm=512, tv=2048, tv1=512,
                     mxu_dtype=jnp.bfloat16, score_dtype=jnp.float32,
                     vmem_limit_bytes=64 * 1024 * 1024):
    """Pallas forward pass.

    tm : token tile for the score matmul (512 is a good default on all of
         v5e / v6e / v7x; it sets how often y [V, J] is re-streamed).
    tv : voken tile for the score matmul (multiple of 128 at real vocab sizes).
    tv1: voken tile for the projection kernel (its VMEM footprint scales with
         voken_dim, so it is decoupled from tv).
    mxu_dtype  : MXU input dtype; bf16 is native on v5e/v6e/v7x (fp32 accumulate,
                 fp32 LayerNorm/gelu math).  Use jnp.float32 for exact math.
    score_dtype: score output dtype; bf16 halves the dominant writeback stream.
    """
    B, L, H = bert_output.shape
    V, voken_dim = voken_feats.shape
    J = JOINT_DIM
    N = B * L

    tm = _pick_tile(N, tm)
    tv = _pick_tile(V, tv)
    tv1 = _pick_tile(V, tv1)

    in_size = jnp.dtype(mxu_dtype).itemsize
    out_size = jnp.dtype(score_dtype).itemsize

    # Pre-cast MXU operands once in HBM so the kernel DMAs move the narrow
    # dtype (no-op for fp32); LN/bias parameters stay fp32.
    x2d = bert_output.reshape(N, H).astype(mxu_dtype)
    vfeat = voken_feats.astype(mxu_dtype)
    w1 = params["w1"].astype(mxu_dtype)
    w2 = params["w2"].astype(mxu_dtype)

    # --- kernel 1: voken projection + layer norm, tiled over V --------------
    y = pl.pallas_call(
        functools.partial(voken_proj_kernel, eps=eps),
        out_shape=jax.ShapeDtypeStruct((V, J), mxu_dtype),
        grid_spec=pltpu.PrefetchScalarGridSpec(
            num_scalar_prefetch=0,
            grid=(pl.cdiv(V, tv1),),
            in_specs=[
                pl.BlockSpec((tv1, voken_dim), lambda v: (v, 0)),   # voken tile
                pl.BlockSpec((voken_dim, J), lambda v: (0, 0)),     # W2
                pl.BlockSpec((1, J), lambda v: (0, 0)),             # ln_y gamma
                pl.BlockSpec((1, J), lambda v: (0, 0)),             # ln_y beta
            ],
            out_specs=pl.BlockSpec((tv1, J), lambda v: (v, 0)),
        ),
        compiler_params=pltpu.CompilerParams(
            dimension_semantics=("parallel",),
            vmem_limit_bytes=vmem_limit_bytes),
        cost_estimate=pl.CostEstimate(
            flops=2 * V * voken_dim * J,
            transcendentals=V,
            bytes_accessed=(V * voken_dim * in_size + voken_dim * J * in_size
                            + V * J * in_size)),
    )(vfeat, w2, params["gy"], params["by"])

    scale = 1.0 / math.sqrt(J)
    n_i = pl.cdiv(N, tm)

    # --- kernel 2: fused token projection + contrastive score ---------------
    score = pl.pallas_call(
        functools.partial(score_kernel, eps=eps, scale=scale),
        out_shape=jax.ShapeDtypeStruct((N, V), score_dtype),
        grid_spec=pltpu.PrefetchScalarGridSpec(
            num_scalar_prefetch=0,
            grid=(n_i, pl.cdiv(V, tv)),
            in_specs=[
                pl.BlockSpec((tm, H), lambda i, j: (i, 0)),   # bert tile (j-invariant)
                pl.BlockSpec((H, J), lambda i, j: (0, 0)),    # W1
                pl.BlockSpec((1, J), lambda i, j: (0, 0)),    # b1
                pl.BlockSpec((1, J), lambda i, j: (0, 0)),    # ln_x gamma
                pl.BlockSpec((1, J), lambda i, j: (0, 0)),    # ln_x beta
                pl.BlockSpec((tv, J), lambda i, j: (j, 0)),   # y tile (voken embeddings)
            ],
            out_specs=pl.BlockSpec((tm, tv), lambda i, j: (i, j)),
            scratch_shapes=[pltpu.VMEM((tm, J), mxu_dtype)],  # cached x per token tile
        ),
        compiler_params=pltpu.CompilerParams(
            # token axis parallel (megacore-shardable on v7x); voken axis must
            # stay sequential so the cached x scratch is valid across j.
            dimension_semantics=("parallel", "arbitrary"),
            vmem_limit_bytes=vmem_limit_bytes),
        cost_estimate=pl.CostEstimate(
            flops=2 * N * V * J + 2 * N * H * J,
            transcendentals=N * J,
            bytes_accessed=(N * H * in_size + H * J * in_size
                            + n_i * V * J * in_size + N * V * out_size)),
    )(x2d, w1, params["b1"], params["gx"], params["bx"], y)

    return score.reshape(B, L, V)


# ----------------------------------------------------------------------------
# Pure-JAX reference for correctness checking.
# ----------------------------------------------------------------------------
def reference(bert_output, voken_feats, params, eps=1e-12):
    x = bert_output @ params["w1"] + params["b1"][0]
    x = 0.5 * x * (1.0 + lax.erf(x / math.sqrt(2.0)))
    x = _layernorm(x, params["gx"][0], params["bx"][0], eps)
    y = voken_feats @ params["w2"]
    y = _layernorm(y, params["gy"][0], params["by"][0], eps)
    return jnp.einsum("ijf,vf->ijv", x, y) / math.sqrt(JOINT_DIM)


if __name__ == "__main__":
    # small, module-consistent shapes
    B, L = 2, 8          # batch, sequence
    H = 32               # config.hidden_size
    VOKEN_DIM = 64       # config.voken_dim
    V = 16               # config.voken_size
    J = JOINT_DIM        # 512 (hardcoded in module)
    EPS = 1e-12          # config.layer_norm_eps

    key = jax.random.PRNGKey(0)
    k = jax.random.split(key, 8)

    bert_output = jax.random.normal(k[0], (B, L, H), dtype=jnp.float32)
    voken_feats = jax.random.normal(k[1], (V, VOKEN_DIM), dtype=jnp.float32)

    # deterministic parameter init (nn.Linear: weight [out,in] -> stored here as [in,out])
    params = {
        "w1": jax.random.normal(k[2], (H, J), dtype=jnp.float32) * (1.0 / math.sqrt(H)),
        "b1": (jax.random.normal(k[3], (1, J), dtype=jnp.float32) * 0.02),
        "gx": jnp.ones((1, J), jnp.float32) + 0.01 * jax.random.normal(k[4], (1, J), dtype=jnp.float32),
        "bx": 0.01 * jax.random.normal(k[5], (1, J), dtype=jnp.float32),
        "w2": jax.random.normal(k[6], (VOKEN_DIM, J), dtype=jnp.float32) * (1.0 / math.sqrt(VOKEN_DIM)),
        "gy": jnp.ones((1, J), jnp.float32),
        "by": jnp.zeros((1, J), jnp.float32),
    }

    ref = reference(bert_output, voken_feats, params, eps=EPS)

    # fp32 path (exact-precision check)
    score_f32 = contrastive_head(bert_output, voken_feats, params, eps=EPS,
                                 mxu_dtype=jnp.float32, score_dtype=jnp.float32)
    score_f32 = jax.block_until_ready(score_f32)
    assert score_f32.ndim == 3 and score_f32.shape == (B, L, V), score_f32.shape
    assert jnp.allclose(score_f32, ref, atol=1e-4, rtol=1e-4), \
        float(jnp.max(jnp.abs(score_f32 - ref)))

    # default perf path: bf16 MXU inputs + bf16 y (fp32 accumulation, fp32 LN/gelu).
    # NOTE: scores carry bf16 rounding of x/y; relaxed tolerance is intentional.
    score_bf16 = contrastive_head(bert_output, voken_feats, params, eps=EPS)
    score_bf16 = jax.block_until_ready(score_bf16)
    assert score_bf16.shape == (B, L, V)
    assert jnp.allclose(score_bf16, ref, atol=5e-2, rtol=5e-2), \
        float(jnp.max(jnp.abs(score_bf16 - ref)))

    # bf16 score writeback (memory-bound regime; halves the dominant HBM stream)
    score_bf16_out = contrastive_head(bert_output, voken_feats, params, eps=EPS,
                                      score_dtype=jnp.bfloat16)
    score_bf16_out = jax.block_until_ready(score_bf16_out)
    assert jnp.allclose(score_bf16_out.astype(jnp.float32), ref, atol=6e-2, rtol=6e-2), \
        float(jnp.max(jnp.abs(score_bf16_out.astype(jnp.float32) - ref)))

    print("KERNEL_OK")
</pallas_src>

<mosaic_0001>
module attributes {stable_mosaic.version = 11 : i64} {
  func.func @voken_proj_kernel(%arg0: i32, %arg1: memref<16x64xf32, #tpu.memory_space<vmem>>, %arg2: memref<64x512xf32, #tpu.memory_space<vmem>>, %arg3: memref<1x512xf32, #tpu.memory_space<vmem>>, %arg4: memref<1x512xf32, #tpu.memory_space<vmem>>, %arg5: memref<16x512xf32, #tpu.memory_space<vmem>>) attributes {dimension_semantics = [#tpu.dimension_semantics<parallel>], iteration_bounds = array<i64: 1>, scalar_prefetch = 0 : i64, scratch_operands = 0 : i64, tpu.core_type = #tpu.core_type<tc>, window_params = [{transform_indices = @transform_0, window_bounds = array<i64: 16, 64>}, {pipeline_mode = #tpu.pipeline_mode<synchronous>, transform_indices = @transform_1, window_bounds = array<i64: 64, 512>}, {pipeline_mode = #tpu.pipeline_mode<synchronous>, transform_indices = @transform_2, window_bounds = array<i64: 1, 512>}, {pipeline_mode = #tpu.pipeline_mode<synchronous>, transform_indices = @transform_3, window_bounds = array<i64: 1, 512>}, {transform_indices = @transform_4, window_bounds = array<i64: 16, 512>}]} {
    %c0 = arith.constant 0 : index
    %c0_0 = arith.constant 0 : index
    %0 = vector.load %arg1[%c0, %c0_0] : memref<16x64xf32, #tpu.memory_space<vmem>>, vector<16x64xf32>
    %c0_1 = arith.constant 0 : index
    %c0_2 = arith.constant 0 : index
    %1 = vector.load %arg2[%c0_1, %c0_2] : memref<64x512xf32, #tpu.memory_space<vmem>>, vector<64x512xf32>
    %cst = arith.constant dense<0.000000e+00> : vector<16x512xf32>
    %2 = tpu.matmul %0, %1, %cst {dimension_numbers = #tpu.dot_dimension_numbers<[1], [0], [0], [1], [0, 0, 1, 1], [], []>} : vector<16x64xf32>, vector<64x512xf32>, vector<16x512xf32> -> vector<16x512xf32>
    %c0_3 = arith.constant 0 : index
    %c0_4 = arith.constant 0 : index
    %3 = vector.load %arg3[%c0_3, %c0_4] : memref<1x512xf32, #tpu.memory_space<vmem>>, vector<1x512xf32>
    %c0_5 = arith.constant 0 : index
    %c0_6 = arith.constant 0 : index
    %4 = vector.load %arg4[%c0_5, %c0_6] : memref<1x512xf32, #tpu.memory_space<vmem>>, vector<1x512xf32>
    %cst_7 = arith.constant dense<0.000000e+00> : vector<16xf32>
    %5 = vector.multi_reduction <add>, %2, %cst_7 [1] : vector<16x512xf32> to vector<16xf32>
    %6 = vector.shape_cast %5 : vector<16xf32> to vector<16x1xf32>
    %cst_8 = arith.constant 5.120000e+02 : f32
    %7 = vector.broadcast %cst_8 : f32 to vector<16x1xf32>
    %8 = arith.divf %6, %7 : vector<16x1xf32>
    %9 = vector.broadcast %8 : vector<16x1xf32> to vector<16x512xf32>
    %10 = arith.subf %2, %9 : vector<16x512xf32>
    %11 = arith.mulf %10, %10 : vector<16x512xf32>
    %cst_9 = arith.constant dense<0.000000e+00> : vector<16xf32>
    %12 = vector.multi_reduction <add>, %11, %cst_9 [1] : vector<16x512xf32> to vector<16xf32>
    %13 = vector.shape_cast %12 : vector<16xf32> to vector<16x1xf32>
    %cst_10 = arith.constant 5.120000e+02 : f32
    %14 = vector.broadcast %cst_10 : f32 to vector<16x1xf32>
    %15 = arith.divf %13, %14 : vector<16x1xf32>
    %16 = vector.broadcast %8 : vector<16x1xf32> to vector<16x512xf32>
    %17 = arith.subf %2, %16 : vector<16x512xf32>
    %cst_11 = arith.constant 9.99999996E-13 : f32
    %18 = vector.broadcast %cst_11 : f32 to vector<16x1xf32>
    %19 = arith.addf %15, %18 : vector<16x1xf32>
    %20 = math.rsqrt %19 : vector<16x1xf32>
    %21 = vector.broadcast %20 : vector<16x1xf32> to vector<16x512xf32>
    %22 = arith.mulf %17, %21 : vector<16x512xf32>
    %23 = vector.broadcast %3 : vector<1x512xf32> to vector<16x512xf32>
    %24 = arith.mulf %22, %23 : vector<16x512xf32>
    %25 = vector.broadcast %4 : vector<1x512xf32> to vector<16x512xf32>
    %26 = arith.addf %24, %25 : vector<16x512xf32>
    %c0_12 = arith.constant 0 : index
    %c0_13 = arith.constant 0 : index
    %27 = vector.load %arg5[%c0_12, %c0_13] : memref<16x512xf32, #tpu.memory_space<vmem>>, vector<16x512xf32>
    tpu.vector_store %arg5[%c0_12, %c0_13], %26 {strides = array<i32>} : memref<16x512xf32, #tpu.memory_space<vmem>>, vector<16x512xf32>,
    return
  }
  func.func @transform_0(%arg0: i32) -> (i32, i32) {
    %c0_i32 = arith.constant 0 : i32
    %c0_i32_0 = arith.constant 0 : i32
    return %arg0, %c0_i32 : i32, i32
  }
  func.func @transform_1(%arg0: i32) -> (i32, i32) {
    %c0_i32 = arith.constant 0 : i32
    %c0_i32_0 = arith.constant 0 : i32
    %c0_i32_1 = arith.constant 0 : i32
    return %c0_i32, %c0_i32_0 : i32, i32
  }
  func.func @transform_2(%arg0: i32) -> (i32, i32) {
    %c0_i32 = arith.constant 0 : i32
    %c0_i32_0 = arith.constant 0 : i32
    %c0_i32_1 = arith.constant 0 : i32
    return %c0_i32, %c0_i32_0 : i32, i32
  }
  func.func @transform_3(%arg0: i32) -> (i32, i32) {
    %c0_i32 = arith.constant 0 : i32
    %c0_i32_0 = arith.constant 0 : i32
    %c0_i32_1 = arith.constant 0 : i32
    return %c0_i32, %c0_i32_0 : i32, i32
  }
  func.func @transform_4(%arg0: i32) -> (i32, i32) {
    %c0_i32 = arith.constant 0 : i32
    %c0_i32_0 = arith.constant 0 : i32
    return %arg0, %c0_i32 : i32, i32
  }
}

</mosaic_0001>

<bundles_post_ra>
// kernel: tpu_custom_call.1
= control target key start
LH: loop header
LB: loop body
LE: loop exit
PB: predicated region body
PF: predicated region fallthrough
CT: control target
= control target key end

     0   :  { %9 = vsyncpa [#allocation3], 0  ;;  %s588_s0 = inlined_call_operand.hbm [shape: f32[16,64], index: 0, kind: input, shape index: {}]   ;;  %s589_s1 = inlined_call_operand.hbm [shape: f32[64,512], index: 1, kind: input, shape index: {}]   ;;  %s590_s2 = inlined_call_operand.hbm [shape: f32[1,512], index: 2, kind: input, shape index: {}]   ;;  %s591_s3 = inlined_call_operand.hbm [shape: f32[1,512], index: 3, kind: input, shape index: {}]   ;;  %s592_s4 = inlined_call_operand.hbm [shape: f32[16,512], index: 4, kind: output, shape index: {}]  }
   0x1   :  { %10 = vsyncpa [#allocation6], 0 }
   0x2   :  { %11 = vsyncpa [#allocation9], 0  ;;  %s30_s17 = sshll.u32 %s589_s1, 4  ;;  %s31_s17 = int_to_ptr.hbm [resolvable:$true] %s30_s17 }
   0x3   :  { %12 = vsyncpa [#allocation4], 0  ;;  %s504_s18 = smov [#allocation5]   ;;  %s17_s22 = sshll.u32 %s588_s0, 4  ;;  %s18_s22 = int_to_ptr.hbm [resolvable:$true] %s17_s22 }
   0x4   :  { %s32_s19 = sshll.u32 %s504_s18, 4  ;;  %s505_s23 = smov 512   ;;  %s33_s19 = int_to_ptr.vmem [resolvable:$true] %s32_s19 }
   0x5   :  { %s506_s24 = smov 32   ;;  %s507_s25 = smov [#allocation2]  }
   0x6   :  { %38 = dma.hbm_to_vmem [thread:$0]  %s31_s17, 4096, %s33_s19, [#allocation6], %s505_s23, %s505_s23, %s506_s24  }
   0x7   :  { %s19_s26 = sshll.u32 %s507_s25, 4  ;;  %s508_s1 = smov 128   ;;  %s20_s26 = int_to_ptr.vmem [resolvable:$true] %s19_s26 }
   0x8   :  { %s509_s27 = smov 8   ;;  %s44_s30 = sshll.u32 %s590_s2, 4  ;;  %s45_s30 = int_to_ptr.hbm [resolvable:$true] %s44_s30 }
   0x9   :  { %25 = dma.hbm_to_vmem [thread:$0]  %s18_s22, 256, %s20_s26, [#allocation3], %s508_s1, %s508_s1, %s509_s27  }
   0xa   :  { %s510_s5 = smov [#allocation7]   ;;  %s55_s8 = sshll.u32 %s591_s3, 4  ;;  %s56_s8 = int_to_ptr.hbm [resolvable:$true] %s55_s8 }
   0xb   :  { %s46_s0 = sshll.u32 %s510_s5, 4  ;;  %s511_s9 = smov [#allocation8]   ;;  %s47_s0 = int_to_ptr.vmem [resolvable:$true] %s46_s0 }
   0xc   :  { %49 = dma.hbm_to_vmem [thread:$0]  %s45_s30, 64, %s47_s0, [#allocation6]  }
   0xd   :  { %s57_s10 = sshll.u32 %s511_s9, 4  ;;  %s58_s10 = int_to_ptr.vmem [resolvable:$true] %s57_s10 }
   0xe   :  { %60 = dma.hbm_to_vmem [thread:$0]  %s56_s8, 64, %s58_s10, [#allocation9]  }
   0xf   :  { %496 = dma.done.wait [#allocation3], 256  }
  0x10   :  { %497 = vsyncadd [#allocation3], 4294967040 }
  0x11   :  { %498 = dma.done.wait [#allocation6], 4160  }
  0x12   :  { %499 = vsyncadd [#allocation6], 4294963136 }
  0x13   :  { %500 = dma.done.wait [#allocation9], 64  }
  0x14   :  { %501 = vsyncadd [#allocation9], 4294967232  ;;  %v109_v0 = vld [vmem:[#allocation5 + $0xf0] sm:$0xff]  ;;  %v110_v2 = vld [vmem:[#allocation5 + $0xf8] sm:$0xff]  ;;  %vm111_vm0 = vcmask 523264   ;;  %v512_v48 = vmov 512.0  }
  0x15   :  { %v105_v1 = vld [vmem:[#allocation5 + $0xd0] sm:$0xff]  ;;  %172 = vmatpush.msra.mxu2 %v109_v0  ;;  %195 = vmatpush.msra.mxu3 %v110_v2  ;;  %v107_v3 = vld [vmem:[#allocation5 + $0xe0] sm:$0xff]  ;;  %v108_v4 = vld [vmem:[#allocation5 + $0xe8] sm:$0xff]  ;;  %370 = vrcp.f32 %v512_v48  ;;  %s513_s2 = smov [#allocation10]   ;;  %s337_s13 = sshll.u32 %s592_s4, 4  ;;  %s338_s13 = int_to_ptr.hbm [resolvable:$true] %s337_s13 }
  0x16   :  { %v101_v5 = vld [vmem:[#allocation5 + $0xb0] sm:$0xff]  ;;  %126 = vmatpush.msra.mxu0 %v107_v3  ;;  %149 = vmatpush.msra.mxu1 %v108_v4  ;;  %v106_v6 = vld [vmem:[#allocation5 + $0xd8] sm:$0xff]  ;;  %v103_v7 = vld [vmem:[#allocation5 + $0xc0] sm:$0xff]  ;;  %s335_s3 = sshll.u32 %s513_s2, 4  ;;  %s336_s3 = int_to_ptr.vmem [resolvable:$true] %s335_s3 }
  0x17   :  { %v104_v8 = vld [vmem:[#allocation5 + $0xc8] sm:$0xff]  ;;  %173 = vmatpush.msra.mxu2 %v105_v1  ;;  %196 = vmatpush.msra.mxu3 %v106_v6  ;;  %v102_v9 = vld [vmem:[#allocation5 + $0xb8] sm:$0xff]  ;;  %v99_v10 = vld [vmem:[#allocation5 + $0xa0] sm:$0xff] }
  0x18   :  { %127 = vmatpush.msra.mxu0 %v103_v7  ;;  %150 = vmatpush.msra.mxu1 %v104_v8  ;;  %v97_v11 = vld [vmem:[#allocation5 + $0x90] sm:$0xff]  ;;  %v100_v12 = vld [vmem:[#allocation5 + $0xa8] sm:$0xff]  ;;  %v98_v13 = vld [vmem:[#allocation5 + $0x98] sm:$0xff] }
  0x19   :  { %174 = vmatpush.msra.mxu2 %v101_v5  ;;  %197 = vmatpush.msra.mxu3 %v102_v9  ;;  %v95_v14 = vld [vmem:[#allocation5 + $0x80] sm:$0xff]  ;;  %v96_v15 = vld [vmem:[#allocation5 + $0x88] sm:$0xff]  ;;  %v93_v16 = vld [vmem:[#allocation5 + $0x70] sm:$0xff] }
  0x1a   :  { %128 = vmatpush.msra.mxu0 %v99_v10  ;;  %151 = vmatpush.msra.mxu1 %v100_v12  ;;  %v94_v17 = vld [vmem:[#allocation5 + $0x78] sm:$0xff]  ;;  %v91_v18 = vld [vmem:[#allocation5 + $0x60] sm:$0xff]  ;;  %v92_v19 = vld [vmem:[#allocation5 + $0x68] sm:$0xff] }
  0x1b   :  { %175 = vmatpush.msra.mxu2 %v97_v11  ;;  %198 = vmatpush.msra.mxu3 %v98_v13  ;;  %v89_v20 = vld [vmem:[#allocation5 + $0x50] sm:$0xff]  ;;  %v90_v21 = vld [vmem:[#allocation5 + $0x58] sm:$0xff]  ;;  %v87_v22 = vld [vmem:[#allocation5 + $0x40] sm:$0xff]  ;;  %v371_v49 = vpop.eup %370 }
  0x1c   :  { %129 = vmatpush.msra.mxu0 %v95_v14  ;;  %152 = vmatpush.msra.mxu1 %v96_v15  ;;  %v88_v23 = vld [vmem:[#allocation5 + $0x48] sm:$0xff]  ;;  %v85_v24 = vld [vmem:[#allocation5 + $0x30] sm:$0xff]  ;;  %v86_v25 = vld [vmem:[#allocation5 + $0x38] sm:$0xff]  ;;  %v223_v50 = vmul.f32 512.0, %v371_v49  ;;  %vm227_vm1 = vweird.f32 %v371_v49 }
  0x1d   :  { %176 = vmatpush.msra.mxu2 %v93_v16  ;;  %199 = vmatpush.msra.mxu3 %v94_v17  ;;  %v83_v26 = vld [vmem:[#allocation5 + $0x20] sm:$0xff]  ;;  %v84_v27 = vld [vmem:[#allocation5 + $0x28] sm:$0xff]  ;;  %v81_v28 = vld [vmem:[#allocation5 + $0x10] sm:$0xff] }
  0x1e   :  { %130 = vmatpush.msra.mxu0 %v91_v18  ;;  %153 = vmatpush.msra.mxu1 %v92_v19  ;;  %v82_v29 = vld [vmem:[#allocation5 + $0x18] sm:$0xff]  ;;  %v77_v30 = vld [vmem:[#allocation2] sm:$0xff]  ;;  %v79_v31 = vld [vmem:[#allocation5] sm:$0xff]  ;;  %v224_v51 = vsub.f32 1.0, %v223_v50 }
  0x1f   :  { %177 = vmatpush.msra.mxu2 %v89_v20  ;;  %200 = vmatpush.msra.mxu3 %v90_v21  ;;  %v80_v32 = vld [vmem:[#allocation5 + $0x8] sm:$0xff]  ;;  %v78_v33 = vld [vmem:[#allocation2 + $0x8] sm:$0xff] }
  0x20   :  { %131 = vmatpush.msra.mxu0 %v87_v22  ;;  %154 = vmatpush.msra.mxu1 %v88_v23  ;;  %v225_v52 = vmul.f32 %v371_v49, %v224_v51 }
  0x21   :  { %178 = vmatpush.msra.mxu2 %v85_v24  ;;  %201 = vmatpush.msra.mxu3 %v86_v25 }
  0x22   :  { %132 = vmatpush.msra.mxu0 %v83_v26  ;;  %155 = vmatpush.msra.mxu1 %v84_v27  ;;  %v226_v53 = vadd.f32 %v371_v49, %v225_v52  ;;  %v210_v27 = vld [vmem:[#allocation7] sm:$0xf] }
  0x23   :  { %179 = vmatpush.msra.mxu2 %v81_v28  ;;  %202 = vmatpush.msra.mxu3 %v82_v29  ;;  %v211_v28 = vld [vmem:[#allocation8] sm:$0xf] }
  0x24   :  { %356 = vmatmul.msk.f32.vlgmr.msra.gmra.mxu2 %vm111_vm0, %v77_v30  ;;  %358 = vmatmul.msk.f32.vlgmr.msra.gmra.mxu3 %vm111_vm0, %v77_v30  ;;  %v228_v54 = vsel %vm227_vm1, %v371_v49, %v226_v53 }
  0x25   :  { %133 = vmatpush.msra.mxu0 %v79_v31  ;;  %156 = vmatpush.msra.mxu1 %v80_v32  ;;  %v290_v31 = vperm.slane %v210_v27, 0 }
  0x26   :  { %352 = vmatmul.msk.f32.vlgmr.msra.gmra.mxu0 %vm111_vm0, %v77_v30  ;;  %354 = vmatmul.msk.f32.vlgmr.msra.gmra.mxu1 %vm111_vm0, %v77_v30 }
  0x2c   :  { %357 = vmatmul.msk.f32.gmra.mxu2 %vm111_vm0, %v78_v33  ;;  %359 = vmatmul.msk.f32.gmra.mxu3 %vm111_vm0, %v78_v33 }
  0x2e   :  { %353 = vmatmul.msk.f32.gmra.mxu0 %vm111_vm0, %v78_v33  ;;  %355 = vmatmul.msk.f32.gmra.mxu1 %vm111_vm0, %v78_v33 }
  0xa3   :  { %v135_v34 = vpop.f32.mrf.mxu0  ;;  %v158_v35 = vpop.f32.mrf.mxu1 }
  0xa4   :  { %v212_v36 = vadd.f32 %v158_v35, %v135_v34 }
  0xa7   :  { %v181_v37 = vpop.f32.mrf.mxu2  ;;  %v204_v38 = vpop.f32.mrf.mxu3 }
  0xa8   :  { %v213_v39 = vadd.f32 %v212_v36, %v181_v37  ;;  %v293_v36 = vperm.slane %v210_v27, 3 }
  0xaa   :  { %v214_v40 = vadd.f32 %v213_v39, %v204_v38  ;;  %v309_v39 = vperm.slane %v211_v28, 2 }
  0xab   :  { %v138_v41 = vpop.f32.mrf.mxu0  ;;  %v161_v42 = vpop.f32.mrf.mxu1 }
  0xac   :  { %215 = vadd.xlane.f32.xlu0 %v214_v40  ;;  %v217_v43 = vadd.f32 %v161_v42, %v138_v41 }
  0xaf   :  { %v184_v44 = vpop.f32.mrf.mxu2  ;;  %v207_v45 = vpop.f32.mrf.mxu3 }
  0xb0   :  { %v218_v46 = vadd.f32 %v217_v43, %v184_v44 }
  0xb2   :  { %v219_v47 = vadd.f32 %v218_v46, %v207_v45  ;;  %v310_v46 = vperm.slane %v211_v28, 3 }
  0xb4   :  { %220 = vadd.xlane.f32.xlu0 %v219_v47 }
 0x11f   :  { %v216_v55 = vpop.xlane.xlu0 %215 }
 0x120   :  { %v229_v56 = vmul.f32 %v228_v54, %v216_v55 }
 0x122   :  { %v231_v57 = vsub.f32 %v135_v34, %v229_v56  ;;  %v232_v58 = vsub.f32 %v158_v35, %v229_v56  ;;  %v233_v59 = vsub.f32 %v181_v37, %v229_v56  ;;  %v234_v60 = vsub.f32 %v204_v38, %v229_v56 }
 0x123   :  { %v291_v34 = vperm.slane %v210_v27, 1  ;;  %v292_v35 = vperm.slane %v210_v27, 2  ;;  %v307_v37 = vperm.slane %v211_v28, 0  ;;  %v308_v38 = vperm.slane %v211_v28, 1 }
 0x124   :  { %v239_v61 = vmul.f32 %v231_v57, %v231_v57  ;;  %v240_v62 = vmul.f32 %v232_v58, %v232_v58  ;;  %v241_v63 = vmul.f32 %v233_v59, %v233_v59  ;;  %v242_v3 = vmul.f32 %v234_v60, %v234_v60 }
 0x126   :  { %v247_v0 = vadd.f32 %v240_v62, %v239_v61 }
 0x127   :  { %v221_v1 = vpop.xlane.xlu0 %220 }
 0x128   :  { %v230_v2 = vmul.f32 %v228_v54, %v221_v1  ;;  %v248_v4 = vadd.f32 %v247_v0, %v241_v63 }
 0x12a   :  { %v562_v5 = vsub.f32 %v138_v41, %v230_v2  ;;  %v564_v6 = vsub.f32 %v161_v42, %v230_v2  ;;  %v249_v7 = vadd.f32 %v248_v4, %v242_v3  ;;  %v566_v8 = vsub.f32 %v184_v44, %v230_v2 }
 0x12b   :  { %v568_v9 = vsub.f32 %v207_v45, %v230_v2 }
 0x12c   :  { %250 = vadd.xlane.f32.xlu1 %v249_v7  ;;  %v243_v10 = vmul.f32 %v562_v5, %v562_v5  ;;  %v244_v11 = vmul.f32 %v564_v6, %v564_v6  ;;  %v245_v12 = vmul.f32 %v566_v8, %v566_v8 }
 0x12d   :  { %v246_v14 = vmul.f32 %v568_v9, %v568_v9 }
 0x12e   :  { %v252_v13 = vadd.f32 %v244_v11, %v243_v10 }
 0x130   :  { %v253_v15 = vadd.f32 %v252_v13, %v245_v12 }
 0x132   :  { %v254_v16 = vadd.f32 %v253_v15, %v246_v14 }
 0x134   :  { %255 = vadd.xlane.f32.xlu1 %v254_v16 }
 0x19f   :  { %v251_v17 = vpop.xlane.xlu1 %250 }
 0x1a0   :  { %v257_v18 = vmul.f32 %v251_v17, %v228_v54 }
 0x1a2   :  { %v259_v19 = vadd.f32 1e-12, %v257_v18 }
 0x1a4   :  { %372 = vrsqrt.f32 %v259_v19  ;;  %vm267_vm3 = vweird.f32 %v259_v19 }
 0x1a7   :  { %v256_v20 = vpop.xlane.xlu1 %255 }
 0x1a8   :  { %v258_v21 = vmul.f32 %v256_v20, %v228_v54 }
 0x1aa   :  { %v373_v22 = vpop.eup %372  ;;  %v260_v23 = vadd.f32 1e-12, %v258_v21 }
 0x1ab   :  { %v262_v24 = vmul.f32 %v373_v22, %v259_v19  ;;  %vm268_vm2 = vweird.f32 %v373_v22 }
 0x1ac   :  { %374 = vrsqrt.f32 %v260_v23  ;;  %vm269_vm4 = vmor %vm267_vm3, %vm268_vm2  ;;  %vm277_vm6 = vweird.f32 %v260_v23 }
 0x1ad   :  { %v263_v25 = vmul.f32 %v373_v22, %v262_v24 }
 0x1af   :  { %v264_v26 = vmul.f32 0.5, %v263_v25 }
 0x1b1   :  { %v265_v29 = vsub.f32 1.5, %v264_v26 }
 0x1b2   :  { %v375_v30 = vpop.eup %374 }
 0x1b3   :  { %v266_v32 = vmul.f32 %v373_v22, %v265_v29  ;;  %v272_v33 = vmul.f32 %v375_v30, %v260_v23  ;;  %vm278_vm5 = vweird.f32 %v375_v30 }
 0x1b4   :  { %vm279_vm7 = vmor %vm277_vm6, %vm278_vm5 }
 0x1b5   :  { %v270_v40 = vsel %vm269_vm4, %v373_v22, %v266_v32  ;;  %v273_v41 = vmul.f32 %v375_v30, %v272_v33 }
 0x1b6   :  { %v281_v42 = vmul.f32 %v270_v40, %v231_v57  ;;  %v282_v43 = vmul.f32 %v270_v40, %v232_v58  ;;  %v283_v44 = vmul.f32 %v270_v40, %v233_v59  ;;  %v284_v45 = vmul.f32 %v270_v40, %v234_v60 }
 0x1b7   :  { %v274_v47 = vmul.f32 0.5, %v273_v41 }
 0x1b8   :  { %v298_v48 = vmul.f32 %v290_v31, %v281_v42  ;;  %v299_v49 = vmul.f32 %v291_v34, %v282_v43  ;;  %v300_v50 = vmul.f32 %v292_v35, %v283_v44  ;;  %v301_v51 = vmul.f32 %v293_v36, %v284_v45 }
 0x1b9   :  { %v275_v52 = vsub.f32 1.5, %v274_v47 }
 0x1ba   :  { %v315_v53 = vadd.f32 %v307_v37, %v298_v48  ;;  %v316_v54 = vadd.f32 %v308_v38, %v299_v49  ;;  %v317_v55 = vadd.f32 %v309_v39, %v300_v50  ;;  %v318_v56 = vadd.f32 %v310_v46, %v301_v51 }
 0x1bb   :  { %v276_v61 = vmul.f32 %v375_v30, %v275_v52 }
 0x1bc   :  { %323 = vst [vmem:[#allocation10] sm:$0xff] %v315_v53 }
 0x1bd   :  { %324 = vst [vmem:[#allocation10 + $0x8] sm:$0xff] %v316_v54  ;;  %v280_v57 = vsel %vm279_vm7, %v375_v30, %v276_v61 }
 0x1be   :  { %325 = vst [vmem:[#allocation10 + $0x10] sm:$0xff] %v317_v55  ;;  %v285_v58 = vmul.f32 %v280_v57, %v562_v5  ;;  %v286_v59 = vmul.f32 %v280_v57, %v564_v6  ;;  %v287_v60 = vmul.f32 %v280_v57, %v566_v8  ;;  %v288_v62 = vmul.f32 %v280_v57, %v568_v9 }
 0x1bf   :  { %326 = vst [vmem:[#allocation10 + $0x18] sm:$0xff] %v318_v56 }
 0x1c0   :  { %v302_v63 = vmul.f32 %v290_v31, %v285_v58  ;;  %v303_v0 = vmul.f32 %v291_v34, %v286_v59  ;;  %v304_v1 = vmul.f32 %v292_v35, %v287_v60  ;;  %v305_v2 = vmul.f32 %v293_v36, %v288_v62 }
 0x1c2   :  { %v319_v3 = vadd.f32 %v307_v37, %v302_v63  ;;  %v320_v4 = vadd.f32 %v308_v38, %v303_v0  ;;  %v321_v7 = vadd.f32 %v309_v39, %v304_v1  ;;  %v322_v5 = vadd.f32 %v310_v46, %v305_v2 }
 0x1c4   :  { %327 = vst [vmem:[#allocation10 + $0x20] sm:$0xff] %v319_v3 }
 0x1c5   :  { %328 = vst [vmem:[#allocation10 + $0x28] sm:$0xff] %v320_v4 }
 0x1c6   :  { %329 = vst [vmem:[#allocation10 + $0x30] sm:$0xff] %v321_v7 }
 0x1c7   :  { %330 = vst [vmem:[#allocation10 + $0x38] sm:$0xff] %v322_v5 }
 0x1c8   :  { %343 = dma.vmem_to_hbm [thread:$0]  %s336_s3, 1024, %s338_s13, [#allocation4], %s505_s23, %s505_s23, %s506_s24  }
 0x1c9   :  { %502 = dma.done.wait [#allocation4], 1024  }
 0x1ca   :  { %503 = vsyncadd [#allocation4], 4294966272 }
 0x1cb   :  { %348 = vsyncpa [#allocation3], 1 }
 0x1cc   :  { %349 = vsyncpa [#allocation6], 1 }
 0x1cd   :  { %350 = vsyncpa [#allocation9], 1 }
 0x1ce   :  { %351 = vsyncpa [#allocation4], 1 }

</bundles_post_ra>
